<compile_context>
chip_gen: v5e
topology: v5e:2x2
jax: 0.10.0
libtpu: 0.0.40
codegen_flags: <defaults>
</compile_context>

<pallas_src>
import functools

import jax
import jax.numpy as jnp
from jax.experimental import pallas as pl
from jax.experimental.pallas import tpu as pltpu


def _round_up(x, m):
    return (x + m - 1) // m * m


# ---------------------------------------------------------------------------
# Kernel 1: conv-as-matmul (bf16 operands, f32 accumulate) + fused BN stats.
# grid = (M/tm, Cout/tn, K/tk); outputs are only written on the last K step.
# ---------------------------------------------------------------------------
def _conv_stats_kernel(a_ref, w_ref, o_ref, sum_ref, sq_ref, acc_ref):
    @pl.when(pl.program_id(2) == 0)
    def _():
        acc_ref[...] = jnp.zeros_like(acc_ref)

    acc_ref[...] += jnp.dot(a_ref[...], w_ref[...],
                            preferred_element_type=jnp.float32)

    @pl.when(pl.program_id(2) == pl.num_programs(2) - 1)
    def _():
        o = acc_ref[...]                       # (tm, tn) f32
        o_ref[...] = o
        tm, tn = o.shape
        og = o.reshape(tm // 8, 8, tn)         # sublane-group view (layout-free)
        sum_ref[...] = jnp.sum(og, axis=0)     # (8, tn) per-tile partial sum
        sq_ref[...] = jnp.sum(og * og, axis=0) # (8, tn) per-tile partial sum sq


# ---------------------------------------------------------------------------
# Kernel 2: fused BatchNorm affine + LeakyReLU(0.1).
# scale/shift are packed into one (2, C_pad) resident block (constant index).
# ---------------------------------------------------------------------------
def _bn_lrelu_kernel(y_ref, p_ref, o_ref):
    scale = p_ref[0:1, :]
    shift = p_ref[1:2, :]
    t = y_ref[...] * scale + shift
    o_ref[...] = jnp.where(t >= 0, t, 0.1 * t)


# ---------------------------------------------------------------------------
# Wrapper
# ---------------------------------------------------------------------------
def darknet_convolutional(x_nchw, weight_oihw, gamma, beta, *,
                          stride=1, padding=0, eps=1e-5,
                          tm_mm=256, tm_bn=512):
    """Forward pass of Darknet_Convolutional.

    x_nchw:      (N, Cin, H, W)       float32
    weight_oihw: (Cout, Cin, KH, KW)  float32  (conv has bias=False)
    gamma, beta: (Cout,)              BatchNorm affine params
    Returns (N, Cout, OH, OW) float32.
    """
    N, Cin, H, W = x_nchw.shape
    Cout, _, KH, KW = weight_oihw.shape
    OH = (H + 2 * padding - KH) // stride + 1
    OW = (W + 2 * padding - KW) // stride + 1

    assert tm_mm % 8 == 0 and tm_bn % tm_mm == 0

    K = KH * KW * Cin
    M = N * OH * OW
    C_pad = _round_up(Cout, 128)
    K_pad = _round_up(K, 128)
    M_pad = _round_up(M, tm_bn)             # handles the M remainder

    tk = next(c for c in (512, 256, 128) if K_pad % c == 0)
    tn = next(c for c in (256, 128) if C_pad % c == 0)
    gm, gn, gk = M_pad // tm_mm, C_pad // tn, K_pad // tk

    # ---- im2col in bf16 (glue, plain JAX) ----------------------------------
    # TODO(synk): replace with an implicit-GEMM BlockSpec that windows the
    # padded NHWC input directly, to avoid materializing the KH*KW-times-larger
    # patch tensor in HBM.
    x_nhwc = jnp.transpose(x_nchw, (0, 2, 3, 1)).astype(jnp.bfloat16)
    xp = jnp.pad(x_nhwc, ((0, 0), (padding, padding), (padding, padding), (0, 0)))
    slabs = []
    for kh in range(KH):
        for kw in range(KW):
            slabs.append(xp[:, kh:kh + OH * stride:stride,
                            kw:kw + OW * stride:stride, :])
    patches = jnp.concatenate(slabs, axis=-1).reshape(M, K)        # (M, K) bf16
    a = jnp.pad(patches, ((0, M_pad - M), (0, K_pad - K)))

    # weight matrix ordered [kh, kw, cin] to match patch concat order
    w_mat = jnp.transpose(weight_oihw, (2, 3, 1, 0)).reshape(K, Cout)
    w = jnp.pad(w_mat.astype(jnp.bfloat16), ((0, K_pad - K), (0, C_pad - Cout)))

    # ---- Kernel 1: tiled matmul + fused per-channel stats -------------------
    conv_out, sum_part, sq_part = pl.pallas_call(
        _conv_stats_kernel,
        out_shape=(jax.ShapeDtypeStruct((M_pad, C_pad), jnp.float32),
                   jax.ShapeDtypeStruct((gm * 8, C_pad), jnp.float32),
                   jax.ShapeDtypeStruct((gm * 8, C_pad), jnp.float32)),
        grid_spec=pltpu.PrefetchScalarGridSpec(
            num_scalar_prefetch=0,
            grid=(gm, gn, gk),
            in_specs=[
                pl.BlockSpec((tm_mm, tk), lambda i, j, k: (i, k)),
                pl.BlockSpec((tk, tn), lambda i, j, k: (k, j)),
            ],
            out_specs=(
                pl.BlockSpec((tm_mm, tn), lambda i, j, k: (i, j)),
                pl.BlockSpec((8, tn), lambda i, j, k: (i, j)),
                pl.BlockSpec((8, tn), lambda i, j, k: (i, j)),
            ),
            scratch_shapes=[pltpu.VMEM((tm_mm, tn), jnp.float32)],
        ),
        compiler_params=pltpu.CompilerParams(
            dimension_semantics=("parallel", "parallel", "arbitrary"),
            vmem_limit_bytes=32 * 1024 * 1024),
    )(a, w)

    # ---- Tiny per-channel math (glue) ---------------------------------------
    m_count = jnp.float32(M)                       # true (unpadded) sample count
    ch_sum = jnp.sum(sum_part, axis=0)             # (C_pad,)
    ch_sq = jnp.sum(sq_part, axis=0)               # (C_pad,)
    mean = ch_sum / m_count
    var = jnp.maximum(ch_sq / m_count - mean * mean, 0.0)  # biased, train-mode BN
    inv_std = jax.lax.rsqrt(var + eps)
    gamma_p = jnp.pad(gamma.astype(jnp.float32), (0, C_pad - Cout))
    beta_p = jnp.pad(beta.astype(jnp.float32), (0, C_pad - Cout))
    scale = gamma_p * inv_std
    shift = beta_p - mean * scale
    params = jnp.stack([scale, shift], axis=0)     # (2, C_pad)

    # ---- Kernel 2: fused BN affine + LeakyReLU ------------------------------
    y = pl.pallas_call(
        _bn_lrelu_kernel,
        out_shape=jax.ShapeDtypeStruct((M_pad, C_pad), jnp.float32),
        grid_spec=pltpu.PrefetchScalarGridSpec(
            num_scalar_prefetch=0,
            grid=(M_pad // tm_bn,),
            in_specs=[
                pl.BlockSpec((tm_bn, C_pad), lambda i: (i, 0)),
                pl.BlockSpec((2, C_pad), lambda i: (0, 0)),
            ],
            out_specs=pl.BlockSpec((tm_bn, C_pad), lambda i: (i, 0)),
        ),
        compiler_params=pltpu.CompilerParams(
            dimension_semantics=("parallel",),
            vmem_limit_bytes=32 * 1024 * 1024),
    )(conv_out, params)

    # strip padding, back to NCHW
    out = y[:M, :Cout].reshape(N, OH, OW, Cout)
    return jnp.transpose(out, (0, 3, 1, 2))


# ---------------------------------------------------------------------------
# Pure-JAX reference (matches the kernel's bf16-operand / f32-accum numerics)
# ---------------------------------------------------------------------------
def reference(x_nchw, weight_oihw, gamma, beta, *, stride, padding, eps=1e-5):
    xr = x_nchw.astype(jnp.bfloat16).astype(jnp.float32)
    wr = weight_oihw.astype(jnp.bfloat16).astype(jnp.float32)
    conv = jax.lax.conv_general_dilated(
        xr, wr,
        window_strides=(stride, stride),
        padding=[(padding, padding), (padding, padding)],
        dimension_numbers=("NCHW", "OIHW", "NCHW"),
        precision=jax.lax.Precision.HIGHEST)
    mean = conv.mean(axis=(0, 2, 3), keepdims=True)
    var = conv.var(axis=(0, 2, 3), keepdims=True)          # biased (BN train mode)
    bn = (conv - mean) * jax.lax.rsqrt(var + eps)
    bn = bn * gamma[None, :, None, None] + beta[None, :, None, None]
    return jnp.where(bn >= 0, bn, 0.1 * bn)


# ---------------------------------------------------------------------------
if __name__ == "__main__":
    # Module config: Darknet_Convolutional(in_channels=4, out_channels=8,
    #                                      kernel_size=3, stride=1, padding=1)
    N, Cin, H, W = 2, 4, 16, 16
    Cout, KH, KW = 8, 3, 3
    stride, padding = 1, 1

    key = jax.random.PRNGKey(0)
    kx, kw, kg, kb = jax.random.split(key, 4)

    x = jax.random.normal(kx, (N, Cin, H, W), dtype=jnp.float32)
    weight = jax.random.normal(kw, (Cout, Cin, KH, KW), dtype=jnp.float32) * 0.1
    gamma = 1.0 + 0.1 * jax.random.normal(kg, (Cout,), dtype=jnp.float32)
    beta = 0.1 * jax.random.normal(kb, (Cout,), dtype=jnp.float32)

    fwd = jax.jit(functools.partial(darknet_convolutional,
                                    stride=stride, padding=padding))
    out = jax.block_until_ready(fwd(x, weight, gamma, beta))

    ref = reference(x, weight, gamma, beta, stride=stride, padding=padding)
    assert out.shape == (N, Cout, H, W)
    assert jnp.allclose(out, ref, atol=5e-3, rtol=5e-3), "mismatch vs reference"

    print("KERNEL_OK")
</pallas_src>

<mosaic_0001>
module attributes {stable_mosaic.version = 11 : i64} {
  func.func @_bn_lrelu_kernel(%arg0: i32, %arg1: memref<512x128xf32, #tpu.memory_space<vmem>>, %arg2: memref<2x128xf32, #tpu.memory_space<vmem>>, %arg3: memref<512x128xf32, #tpu.memory_space<vmem>>) attributes {dimension_semantics = [#tpu.dimension_semantics<parallel>], iteration_bounds = array<i64: 1>, scalar_prefetch = 0 : i64, scratch_operands = 0 : i64, tpu.core_type = #tpu.core_type<tc>, window_params = [{transform_indices = @transform_0, window_bounds = array<i64: 512, 128>}, {pipeline_mode = #tpu.pipeline_mode<synchronous>, transform_indices = @transform_1, window_bounds = array<i64: 2, 128>}, {transform_indices = @transform_2, window_bounds = array<i64: 512, 128>}]} {
    %c0 = arith.constant 0 : index
    %c0_0 = arith.constant 0 : index
    %0 = vector.load %arg2[%c0, %c0_0] : memref<2x128xf32, #tpu.memory_space<vmem>>, vector<1x128xf32>
    %c1 = arith.constant 1 : index
    %c0_1 = arith.constant 0 : index
    %1 = vector.load %arg2[%c1, %c0_1] : memref<2x128xf32, #tpu.memory_space<vmem>>, vector<1x128xf32>
    %c0_2 = arith.constant 0 : index
    %c0_3 = arith.constant 0 : index
    %2 = vector.load %arg1[%c0_2, %c0_3] : memref<512x128xf32, #tpu.memory_space<vmem>>, vector<512x128xf32>
    %3 = vector.broadcast %0 : vector<1x128xf32> to vector<512x128xf32>
    %4 = arith.mulf %2, %3 : vector<512x128xf32>
    %5 = vector.broadcast %1 : vector<1x128xf32> to vector<512x128xf32>
    %6 = arith.addf %4, %5 : vector<512x128xf32>
    %cst = arith.constant 0.000000e+00 : f32
    %7 = vector.broadcast %cst : f32 to vector<512x128xf32>
    %8 = arith.cmpf oge, %6, %7 : vector<512x128xf32>
    %cst_4 = arith.constant 1.000000e-01 : f32
    %9 = vector.broadcast %cst_4 : f32 to vector<512x128xf32>
    %10 = arith.mulf %9, %6 : vector<512x128xf32>
    %11 = arith.select %8, %6, %10 : vector<512x128xi1>, vector<512x128xf32>
    %c0_5 = arith.constant 0 : index
    %c0_6 = arith.constant 0 : index
    %12 = vector.load %arg3[%c0_5, %c0_6] : memref<512x128xf32, #tpu.memory_space<vmem>>, vector<512x128xf32>
    tpu.vector_store %arg3[%c0_5, %c0_6], %11 {strides = array<i32>} : memref<512x128xf32, #tpu.memory_space<vmem>>, vector<512x128xf32>,
    return
  }
  func.func @transform_0(%arg0: i32) -> (i32, i32) {
    %c0_i32 = arith.constant 0 : i32
    %c0_i32_0 = arith.constant 0 : i32
    return %arg0, %c0_i32 : i32, i32
  }
  func.func @transform_1(%arg0: i32) -> (i32, i32) {
    %c0_i32 = arith.constant 0 : i32
    %c0_i32_0 = arith.constant 0 : i32
    %c0_i32_1 = arith.constant 0 : i32
    return %c0_i32, %c0_i32_0 : i32, i32
  }
  func.func @transform_2(%arg0: i32) -> (i32, i32) {
    %c0_i32 = arith.constant 0 : i32
    %c0_i32_0 = arith.constant 0 : i32
    return %arg0, %c0_i32 : i32, i32
  }
}

module attributes {stable_mosaic.version = 11 : i64} {
  func.func @_conv_stats_kernel(%arg0: i32, %arg1: i32, %arg2: i32, %arg3: memref<256x128xbf16, #tpu.memory_space<vmem>>, %arg4: memref<128x128xbf16, #tpu.memory_space<vmem>>, %arg5: memref<256x128xf32, #tpu.memory_space<vmem>>, %arg6: memref<8x128xf32, #tpu.memory_space<vmem>>, %arg7: memref<8x128xf32, #tpu.memory_space<vmem>>, %arg8: memref<256x128xf32, #tpu.memory_space<vmem>>) attributes {dimension_semantics = [#tpu.dimension_semantics<parallel>, #tpu.dimension_semantics<parallel>, #tpu.dimension_semantics<arbitrary>], iteration_bounds = array<i64: 2, 1, 1>, scalar_prefetch = 0 : i64, scratch_operands = 1 : i64, tpu.core_type = #tpu.core_type<tc>, window_params = [{transform_indices = @transform_0, window_bounds = array<i64: 256, 128>}, {transform_indices = @transform_1, window_bounds = array<i64: 128, 128>}, {transform_indices = @transform_2, window_bounds = array<i64: 256, 128>}, {transform_indices = @transform_3, window_bounds = array<i64: 8, 128>}, {transform_indices = @transform_4, window_bounds = array<i64: 8, 128>}]} {
    %c0_i32 = arith.constant 0 : i32
    %0 = arith.cmpi eq, %arg2, %c0_i32 : i32
    %1 = arith.extui %0 : i1 to i32
    %c0_i32_0 = arith.constant 0 : i32
    %2 = arith.cmpi ne, %1, %c0_i32_0 : i32
    scf.if %2 {
      %cst_10 = arith.constant 0.000000e+00 : f32
      %12 = vector.broadcast %cst_10 : f32 to vector<256x128xf32>
      %c0_11 = arith.constant 0 : index
      %c0_12 = arith.constant 0 : index
      %13 = vector.load %arg8[%c0_11, %c0_12] : memref<256x128xf32, #tpu.memory_space<vmem>>, vector<256x128xf32>
      tpu.vector_store %arg8[%c0_11, %c0_12], %12 {strides = array<i32>} : memref<256x128xf32, #tpu.memory_space<vmem>>, vector<256x128xf32>,
    } else {
    }
    %c0 = arith.constant 0 : index
    %c0_1 = arith.constant 0 : index
    %3 = vector.load %arg8[%c0, %c0_1] : memref<256x128xf32, #tpu.memory_space<vmem>>, vector<256x128xf32>
    %c0_2 = arith.constant 0 : index
    %c0_3 = arith.constant 0 : index
    %4 = vector.load %arg3[%c0_2, %c0_3] : memref<256x128xbf16, #tpu.memory_space<vmem>>, vector<256x128xbf16>
    %c0_4 = arith.constant 0 : index
    %c0_5 = arith.constant 0 : index
    %5 = vector.load %arg4[%c0_4, %c0_5] : memref<128x128xbf16, #tpu.memory_space<vmem>>, vector<128x128xbf16>
    %cst = arith.constant dense<0.000000e+00> : vector<256x128xf32>
    %6 = tpu.matmul %4, %5, %cst {dimension_numbers = #tpu.dot_dimension_numbers<[1], [0], [0], [1], [0, 0, 1, 1], [], []>} : vector<256x128xbf16>, vector<128x128xbf16>, vector<256x128xf32> -> vector<256x128xf32>
    %7 = arith.addf %3, %6 : vector<256x128xf32>
    %c0_6 = arith.constant 0 : index
    %c0_7 = arith.constant 0 : index
    %8 = vector.load %arg8[%c0_6, %c0_7] : memref<256x128xf32, #tpu.memory_space<vmem>>, vector<256x128xf32>
    tpu.vector_store %arg8[%c0_6, %c0_7], %7 {strides = array<i32>} : memref<256x128xf32, #tpu.memory_space<vmem>>, vector<256x128xf32>,
    %c0_i32_8 = arith.constant 0 : i32
    %9 = arith.cmpi eq, %arg2, %c0_i32_8 : i32
    %10 = arith.extui %9 : i1 to i32
    %c0_i32_9 = arith.constant 0 : i32
    %11 = arith.cmpi ne, %10, %c0_i32_9 : i32
    scf.if %11 {
      %c0_10 = arith.constant 0 : index
      %c0_11 = arith.constant 0 : index
      %12 = vector.load %arg8[%c0_10, %c0_11] : memref<256x128xf32, #tpu.memory_space<vmem>>, vector<256x128xf32>
      %c0_12 = arith.constant 0 : index
      %c0_13 = arith.constant 0 : index
      %13 = vector.load %arg5[%c0_12, %c0_13] : memref<256x128xf32, #tpu.memory_space<vmem>>, vector<256x128xf32>
      tpu.vector_store %arg5[%c0_12, %c0_13], %12 {strides = array<i32>} : memref<256x128xf32, #tpu.memory_space<vmem>>, vector<256x128xf32>,
      %14 = vector.shape_cast %12 : vector<256x128xf32> to vector<32x8x128xf32>
      %cst_14 = arith.constant dense<0.000000e+00> : vector<8x128xf32>
      %15 = vector.multi_reduction <add>, %14, %cst_14 [0] : vector<32x8x128xf32> to vector<8x128xf32>
      %c0_15 = arith.constant 0 : index
      %c0_16 = arith.constant 0 : index
      %16 = vector.load %arg6[%c0_15, %c0_16] : memref<8x128xf32, #tpu.memory_space<vmem>>, vector<8x128xf32>
      tpu.vector_store %arg6[%c0_15, %c0_16], %15 {strides = array<i32>} : memref<8x128xf32, #tpu.memory_space<vmem>>, vector<8x128xf32>,
      %17 = arith.mulf %14, %14 : vector<32x8x128xf32>
      %cst_17 = arith.constant dense<0.000000e+00> : vector<8x128xf32>
      %18 = vector.multi_reduction <add>, %17, %cst_17 [0] : vector<32x8x128xf32> to vector<8x128xf32>
      %c0_18 = arith.constant 0 : index
      %c0_19 = arith.constant 0 : index
      %19 = vector.load %arg7[%c0_18, %c0_19] : memref<8x128xf32, #tpu.memory_space<vmem>>, vector<8x128xf32>
      tpu.vector_store %arg7[%c0_18, %c0_19], %18 {strides = array<i32>} : memref<8x128xf32, #tpu.memory_space<vmem>>, vector<8x128xf32>,
    } else {
    }
    return
  }
  func.func @transform_0(%arg0: i32, %arg1: i32, %arg2: i32) -> (i32, i32) {
    %c0_i32 = arith.constant 0 : i32
    return %arg0, %arg2 : i32, i32
  }
  func.func @transform_1(%arg0: i32, %arg1: i32, %arg2: i32) -> (i32, i32) {
    %c0_i32 = arith.constant 0 : i32
    return %arg2, %arg1 : i32, i32
  }
  func.func @transform_2(%arg0: i32, %arg1: i32, %arg2: i32) -> (i32, i32) {
    %c0_i32 = arith.constant 0 : i32
    return %arg0, %arg1 : i32, i32
  }
  func.func @transform_3(%arg0: i32, %arg1: i32, %arg2: i32) -> (i32, i32) {
    %c0_i32 = arith.constant 0 : i32
    return %arg0, %arg1 : i32, i32
  }
  func.func @transform_4(%arg0: i32, %arg1: i32, %arg2: i32) -> (i32, i32) {
    %c0_i32 = arith.constant 0 : i32
    return %arg0, %arg1 : i32, i32
  }
}

</mosaic_0001>

<bundles_post_ra>
// kernel: darknet_convolutional.3
= control target key start
LH: loop header
LB: loop body
LE: loop exit
PB: predicated region body
PF: predicated region fallthrough
CT: control target
= control target key end

     0   :  { %s1010_s0 = inlined_call_operand.vmem [shape: f32[512,128], index: 0, kind: input, shape index: {}]   ;;  %s1011_s1 = inlined_call_operand.vmem [shape: f32[2,128], index: 1, kind: input, shape index: {}]   ;;  %s1012_s2 = inlined_call_operand.vmem [shape: f32[512,128], index: 2, kind: output, shape index: {}]  }
   0x1   :  { %v13_v0 = vld [vmem:[%s1010_s0] sm:$0xff]  ;;  %v14_v3 = vld [vmem:[%s1010_s0 + $0x8] sm:$0xff]  ;;  %v15_v4 = vld [vmem:[%s1010_s0 + $0x10] sm:$0xff] }
   0x2   :  { %v490_v1 = vld [vmem:[%s1011_s1] ss:$0 sm:$0xff]  ;;  %v495_v2 = vld [vmem:[%s1011_s1 + $0x1] ss:$0 sm:$0xff]  ;;  %v16_v5 = vld [vmem:[%s1010_s0 + $0x18] sm:$0xff] }
   0x3   :  { %v17_v6 = vld [vmem:[%s1010_s0 + $0x20] sm:$0xff]  ;;  %v78_v7 = vmul.f32 %v490_v1, %v13_v0  ;;  %v79_v8 = vmul.f32 %v490_v1, %v14_v3  ;;  %v80_v9 = vmul.f32 %v490_v1, %v15_v4  ;;  %v81_v10 = vmul.f32 %v490_v1, %v16_v5  ;;  %v18_v11 = vld [vmem:[%s1010_s0 + $0x28] sm:$0xff]  ;;  %v19_v12 = vld [vmem:[%s1010_s0 + $0x30] sm:$0xff] }
   0x4   :  { %v20_v13 = vld [vmem:[%s1010_s0 + $0x38] sm:$0xff]  ;;  %v82_v14 = vmul.f32 %v490_v1, %v17_v6  ;;  %v83_v15 = vmul.f32 %v490_v1, %v18_v11  ;;  %v84_v16 = vmul.f32 %v490_v1, %v19_v12  ;;  %v21_v33 = vld [vmem:[%s1010_s0 + $0x40] sm:$0xff]  ;;  %v22_v34 = vld [vmem:[%s1010_s0 + $0x48] sm:$0xff] }
   0x5   :  { %v85_v17 = vmul.f32 %v490_v1, %v20_v13  ;;  %v143_v18 = vadd.f32 %v495_v2, %v78_v7  ;;  %v144_v19 = vadd.f32 %v495_v2, %v79_v8  ;;  %v145_v20 = vadd.f32 %v495_v2, %v80_v9  ;;  %v23_v38 = vld [vmem:[%s1010_s0 + $0x50] sm:$0xff]  ;;  %v24_v39 = vld [vmem:[%s1010_s0 + $0x58] sm:$0xff]  ;;  %v25_v40 = vld [vmem:[%s1010_s0 + $0x60] sm:$0xff] }
   0x6   :  { %v146_v21 = vadd.f32 %v495_v2, %v81_v10  ;;  %v147_v22 = vadd.f32 %v495_v2, %v82_v14  ;;  %v148_v23 = vadd.f32 %v495_v2, %v83_v15  ;;  %v149_v24 = vadd.f32 %v495_v2, %v84_v16  ;;  %v26_v43 = vld [vmem:[%s1010_s0 + $0x68] sm:$0xff]  ;;  %v27_v48 = vld [vmem:[%s1010_s0 + $0x70] sm:$0xff]  ;;  %v28_v63 = vld [vmem:[%s1010_s0 + $0x78] sm:$0xff] }
   0x7   :  { %v150_v25 = vadd.f32 %v495_v2, %v85_v17  ;;  %vm207_vm0 = vcmp.ge.f32.partialorder %v143_v18, 0.0  ;;  %v271_v26 = vmul.f32 0.1, %v143_v18  ;;  %vm208_vm1 = vcmp.ge.f32.partialorder %v144_v19, 0.0  ;;  %v29_v0 = vld [vmem:[%s1010_s0 + $0x80] sm:$0xff]  ;;  %v30_v8 = vld [vmem:[%s1010_s0 + $0x88] sm:$0xff] }
   0x8   :  { %v272_v27 = vmul.f32 0.1, %v144_v19  ;;  %vm209_vm2 = vcmp.ge.f32.partialorder %v145_v20, 0.0  ;;  %v273_v28 = vmul.f32 0.1, %v145_v20  ;;  %vm210_vm3 = vcmp.ge.f32.partialorder %v146_v21, 0.0 }
   0x9   :  { %v274_v29 = vmul.f32 0.1, %v146_v21  ;;  %v335_v30 = vsel %vm207_vm0, %v143_v18, %v271_v26  ;;  %vm211_vm4 = vcmp.ge.f32.partialorder %v147_v22, 0.0  ;;  %v275_v32 = vmul.f32 0.1, %v147_v22  ;;  %v31_v9 = vld [vmem:[%s1010_s0 + $0x90] sm:$0xff] }
   0xa   :  { %v336_v31 = vsel %vm208_vm1, %v144_v19, %v272_v27  ;;  %399 = vst [vmem:[%s1012_s2] sm:$0xff] %v335_v30  ;;  %v337_v35 = vsel %vm209_vm2, %v145_v20, %v273_v28  ;;  %vm212_vm5 = vcmp.ge.f32.partialorder %v148_v23, 0.0  ;;  %v276_v37 = vmul.f32 0.1, %v148_v23  ;;  %v32_v13 = vld [vmem:[%s1010_s0 + $0x98] sm:$0xff]  ;;  %v33_v14 = vld [vmem:[%s1010_s0 + $0xa0] sm:$0xff] }
   0xb   :  { %v338_v36 = vsel %vm210_vm3, %v146_v21, %v274_v29  ;;  %400 = vst [vmem:[%s1012_s2 + $0x8] sm:$0xff] %v336_v31  ;;  %v339_v41 = vsel %vm211_vm4, %v147_v22, %v275_v32  ;;  %vm213_vm6 = vcmp.ge.f32.partialorder %v149_v24, 0.0  ;;  %v277_v42 = vmul.f32 0.1, %v149_v24  ;;  %v34_v22 = vld [vmem:[%s1010_s0 + $0xa8] sm:$0xff] }
   0xc   :  { %vm214_vm7 = vcmp.ge.f32.partialorder %v150_v25, 0.0  ;;  %401 = vst [vmem:[%s1012_s2 + $0x10] sm:$0xff] %v337_v35  ;;  %v340_v44 = vsel %vm212_vm5, %v148_v23, %v276_v37  ;;  %v278_v45 = vmul.f32 0.1, %v150_v25  ;;  %v86_v46 = vmul.f32 %v490_v1, %v21_v33  ;;  %v35_v23 = vld [vmem:[%s1010_s0 + $0xb0] sm:$0xff] }
   0xd   :  { %v87_v47 = vmul.f32 %v490_v1, %v22_v34  ;;  %402 = vst [vmem:[%s1012_s2 + $0x18] sm:$0xff] %v338_v36  ;;  %v341_v49 = vsel %vm213_vm6, %v149_v24, %v277_v42  ;;  %v88_v50 = vmul.f32 %v490_v1, %v23_v38  ;;  %v89_v51 = vmul.f32 %v490_v1, %v24_v39 }
   0xe   :  { %v90_v52 = vmul.f32 %v490_v1, %v25_v40  ;;  %403 = vst [vmem:[%s1012_s2 + $0x20] sm:$0xff] %v339_v41  ;;  %v342_v53 = vsel %vm214_vm7, %v150_v25, %v278_v45  ;;  %v151_v54 = vadd.f32 %v495_v2, %v86_v46  ;;  %v91_v56 = vmul.f32 %v490_v1, %v26_v43  ;;  %v36_v43 = vld [vmem:[%s1010_s0 + $0xb8] sm:$0xff] }
   0xf   :  { %v152_v55 = vadd.f32 %v495_v2, %v87_v47  ;;  %404 = vst [vmem:[%s1012_s2 + $0x28] sm:$0xff] %v340_v44  ;;  %v153_v57 = vadd.f32 %v495_v2, %v88_v50  ;;  %v154_v58 = vadd.f32 %v495_v2, %v89_v51  ;;  %v92_v60 = vmul.f32 %v490_v1, %v27_v48  ;;  %v37_v48 = vld [vmem:[%s1010_s0 + $0xc0] sm:$0xff] }
  0x10   :  { %v155_v59 = vadd.f32 %v495_v2, %v90_v52  ;;  %405 = vst [vmem:[%s1012_s2 + $0x30] sm:$0xff] %v341_v49  ;;  %vm215_vm8 = vcmp.ge.f32.partialorder %v151_v54, 0.0  ;;  %v279_v61 = vmul.f32 0.1, %v151_v54  ;;  %v156_v62 = vadd.f32 %v495_v2, %v91_v56  ;;  %v38_v49 = vld [vmem:[%s1010_s0 + $0xc8] sm:$0xff] }
  0x11   :  { %vm216_vm9 = vcmp.ge.f32.partialorder %v152_v55, 0.0  ;;  %406 = vst [vmem:[%s1012_s2 + $0x38] sm:$0xff] %v342_v53  ;;  %v280_v3 = vmul.f32 0.1, %v152_v55  ;;  %vm217_vm10 = vcmp.ge.f32.partialorder %v153_v57, 0.0  ;;  %v157_v5 = vadd.f32 %v495_v2, %v92_v60  ;;  %v39_v53 = vld [vmem:[%s1010_s0 + $0xd0] sm:$0xff] }
  0x12   :  { %v281_v4 = vmul.f32 0.1, %v153_v57  ;;  %v343_v6 = vsel %vm215_vm8, %v151_v54, %v279_v61  ;;  %vm218_vm11 = vcmp.ge.f32.partialorder %v154_v58, 0.0  ;;  %v282_v7 = vmul.f32 0.1, %v154_v58  ;;  %v40_v54 = vld [vmem:[%s1010_s0 + $0xd8] sm:$0xff] }
  0x13   :  { %vm219_vm12 = vcmp.ge.f32.partialorder %v155_v59, 0.0  ;;  %407 = vst [vmem:[%s1012_s2 + $0x40] sm:$0xff] %v343_v6  ;;  %v344_v10 = vsel %vm216_vm9, %v152_v55, %v280_v3  ;;  %v283_v12 = vmul.f32 0.1, %v155_v59  ;;  %vm220_vm13 = vcmp.ge.f32.partialorder %v156_v62, 0.0 }
  0x14   :  { %v345_v11 = vsel %vm217_vm10, %v153_v57, %v281_v4  ;;  %408 = vst [vmem:[%s1012_s2 + $0x48] sm:$0xff] %v344_v10  ;;  %v346_v15 = vsel %vm218_vm11, %v154_v58, %v282_v7  ;;  %v284_v16 = vmul.f32 0.1, %v156_v62  ;;  %vm221_vm14 = vcmp.ge.f32.partialorder %v157_v5, 0.0  ;;  %v41_v57 = vld [vmem:[%s1010_s0 + $0xe0] sm:$0xff] }
  0x15   :  { %v285_v17 = vmul.f32 0.1, %v157_v5  ;;  %409 = vst [vmem:[%s1012_s2 + $0x50] sm:$0xff] %v345_v11  ;;  %v347_v18 = vsel %vm219_vm12, %v155_v59, %v283_v12  ;;  %v93_v19 = vmul.f32 %v490_v1, %v28_v63  ;;  %v94_v20 = vmul.f32 %v490_v1, %v29_v0  ;;  %v43_v12 = vld [vmem:[%s1010_s0 + $0xf0] sm:$0xff] }
  0x16   :  { %v95_v21 = vmul.f32 %v490_v1, %v30_v8  ;;  %410 = vst [vmem:[%s1012_s2 + $0x58] sm:$0xff] %v346_v15  ;;  %v348_v24 = vsel %vm220_vm13, %v156_v62, %v284_v16  ;;  %v96_v26 = vmul.f32 %v490_v1, %v31_v9  ;;  %v97_v27 = vmul.f32 %v490_v1, %v32_v13  ;;  %v42_v8 = vld [vmem:[%s1010_s0 + $0xe8] sm:$0xff]  ;;  %v44_v13 = vld [vmem:[%s1010_s0 + $0xf8] sm:$0xff]  ;;  %v45_v16 = vld [vmem:[%s1010_s0 + $0x100] sm:$0xff] }
  0x17   :  { %v349_v25 = vsel %vm221_vm14, %v157_v5, %v285_v17  ;;  %411 = vst [vmem:[%s1012_s2 + $0x60] sm:$0xff] %v347_v18  ;;  %v158_v28 = vadd.f32 %v495_v2, %v93_v19  ;;  %v159_v29 = vadd.f32 %v495_v2, %v94_v20  ;;  %v98_v31 = vmul.f32 %v490_v1, %v33_v14  ;;  %v46_v20 = vld [vmem:[%s1010_s0 + $0x108] sm:$0xff] }
  0x18   :  { %v160_v30 = vadd.f32 %v495_v2, %v95_v21  ;;  %412 = vst [vmem:[%s1012_s2 + $0x68] sm:$0xff] %v348_v24  ;;  %v161_v32 = vadd.f32 %v495_v2, %v96_v26  ;;  %v162_v33 = vadd.f32 %v495_v2, %v97_v27  ;;  %v99_v34 = vmul.f32 %v490_v1, %v34_v22 }
  0x19   :  { %v100_v35 = vmul.f32 %v490_v1, %v35_v23  ;;  %413 = vst [vmem:[%s1012_s2 + $0x70] sm:$0xff] %v349_v25  ;;  %vm222_vm15 = vcmp.ge.f32.partialorder %v158_v28, 0.0  ;;  %v286_v36 = vmul.f32 0.1, %v158_v28  ;;  %vm223_vm0 = vcmp.ge.f32.partialorder %v159_v29, 0.0  ;;  %v47_v23 = vld [vmem:[%s1010_s0 + $0x110] sm:$0xff] }
  0x1a   :  { %vm224_vm1 = vcmp.ge.f32.partialorder %v160_v30, 0.0  ;;  %v287_v37 = vmul.f32 0.1, %v159_v29  ;;  %v288_v38 = vmul.f32 0.1, %v160_v30  ;;  %vm225_vm2 = vcmp.ge.f32.partialorder %v161_v32, 0.0 }
  0x1b   :  { %vm226_vm3 = vcmp.ge.f32.partialorder %v162_v33, 0.0  ;;  %v350_v39 = vsel %vm222_vm15, %v158_v28, %v286_v36  ;;  %v289_v40 = vmul.f32 0.1, %v161_v32  ;;  %v290_v41 = vmul.f32 0.1, %v162_v33  ;;  %v48_v28 = vld [vmem:[%s1010_s0 + $0x118] sm:$0xff] }
  0x1c   :  { %v163_v42 = vadd.f32 %v495_v2, %v98_v31  ;;  %414 = vst [vmem:[%s1012_s2 + $0x78] sm:$0xff] %v350_v39  ;;  %v351_v44 = vsel %vm223_vm0, %v159_v29, %v287_v37  ;;  %v352_v45 = vsel %vm224_vm1, %v160_v30, %v288_v38  ;;  %v164_v46 = vadd.f32 %v495_v2, %v99_v34 }
  0x1d   :  { %v165_v47 = vadd.f32 %v495_v2, %v100_v35  ;;  %415 = vst [vmem:[%s1012_s2 + $0x80] sm:$0xff] %v351_v44  ;;  %v353_v50 = vsel %vm225_vm2, %v161_v32, %v289_v40  ;;  %v354_v51 = vsel %vm226_vm3, %v162_v33, %v290_v41  ;;  %v101_v56 = vmul.f32 %v490_v1, %v36_v43  ;;  %v49_v44 = vld [vmem:[%s1010_s0 + $0x120] sm:$0xff] }
  0x1e   :  { %vm227_vm4 = vcmp.ge.f32.partialorder %v163_v42, 0.0  ;;  %v291_v52 = vmul.f32 0.1, %v163_v42  ;;  %416 = vst [vmem:[%s1012_s2 + $0x88] sm:$0xff] %v352_v45  ;;  %vm228_vm5 = vcmp.ge.f32.partialorder %v164_v46, 0.0  ;;  %v102_v60 = vmul.f32 %v490_v1, %v37_v48  ;;  %v50_v45 = vld [vmem:[%s1010_s0 + $0x128] sm:$0xff] }
  0x1f   :  { %v292_v55 = vmul.f32 0.1, %v164_v46  ;;  %vm229_vm6 = vcmp.ge.f32.partialorder %v165_v47, 0.0  ;;  %417 = vst [vmem:[%s1012_s2 + $0x90] sm:$0xff] %v353_v50  ;;  %v293_v59 = vmul.f32 0.1, %v165_v47  ;;  %v103_v61 = vmul.f32 %v490_v1, %v38_v49 }
  0x20   :  { %v355_v58 = vsel %vm227_vm4, %v163_v42, %v291_v52  ;;  %418 = vst [vmem:[%s1012_s2 + $0x98] sm:$0xff] %v354_v51  ;;  %v166_v63 = vadd.f32 %v495_v2, %v101_v56  ;;  %v104_v0 = vmul.f32 %v490_v1, %v39_v53  ;;  %v105_v3 = vmul.f32 %v490_v1, %v40_v54  ;;  %v51_v50 = vld [vmem:[%s1010_s0 + $0x130] sm:$0xff]  ;;  %v52_v51 = vld [vmem:[%s1010_s0 + $0x138] sm:$0xff] }
  0x21   :  { %v356_v62 = vsel %vm228_vm5, %v164_v46, %v292_v55  ;;  %419 = vst [vmem:[%s1012_s2 + $0xa0] sm:$0xff] %v355_v58  ;;  %v357_v4 = vsel %vm229_vm6, %v165_v47, %v293_v59  ;;  %v167_v5 = vadd.f32 %v495_v2, %v102_v60  ;;  %v168_v6 = vadd.f32 %v495_v2, %v103_v61  ;;  %v53_v59 = vld [vmem:[%s1010_s0 + $0x140] sm:$0xff] }
  0x22   :  { %v106_v7 = vmul.f32 %v490_v1, %v41_v57  ;;  %420 = vst [vmem:[%s1012_s2 + $0xa8] sm:$0xff] %v356_v62  ;;  %vm230_vm7 = vcmp.ge.f32.partialorder %v166_v63, 0.0  ;;  %v294_v9 = vmul.f32 0.1, %v166_v63  ;;  %v169_v10 = vadd.f32 %v495_v2, %v104_v0  ;;  %v54_v0 = vld [vmem:[%s1010_s0 + $0x148] sm:$0xff] }
  0x23   :  { %v170_v11 = vadd.f32 %v495_v2, %v105_v3  ;;  %421 = vst [vmem:[%s1012_s2 + $0xb0] sm:$0xff] %v357_v4  ;;  %vm231_vm8 = vcmp.ge.f32.partialorder %v167_v5, 0.0  ;;  %v295_v14 = vmul.f32 0.1, %v167_v5  ;;  %vm232_vm9 = vcmp.ge.f32.partialorder %v168_v6, 0.0 }
  0x24   :  { %v171_v15 = vadd.f32 %v495_v2, %v106_v7  ;;  %v358_v17 = vsel %vm230_vm7, %v166_v63, %v294_v9  ;;  %v296_v18 = vmul.f32 0.1, %v168_v6  ;;  %vm233_vm10 = vcmp.ge.f32.partialorder %v169_v10, 0.0 }
  0x25   :  { %v297_v19 = vmul.f32 0.1, %v169_v10  ;;  %422 = vst [vmem:[%s1012_s2 + $0xb8] sm:$0xff] %v358_v17  ;;  %v359_v21 = vsel %vm231_vm8, %v167_v5, %v295_v14  ;;  %vm234_vm11 = vcmp.ge.f32.partialorder %v170_v11, 0.0  ;;  %v298_v22 = vmul.f32 0.1, %v170_v11 }
  0x26   :  { %vm235_vm12 = vcmp.ge.f32.partialorder %v171_v15, 0.0  ;;  %423 = vst [vmem:[%s1012_s2 + $0xc0] sm:$0xff] %v359_v21  ;;  %v360_v24 = vsel %vm232_vm9, %v168_v6, %v296_v18  ;;  %v299_v26 = vmul.f32 0.1, %v171_v15  ;;  %v107_v27 = vmul.f32 %v490_v1, %v42_v8  ;;  %v56_v14 = vld [vmem:[%s1010_s0 + $0x158] sm:$0xff] }
  0x27   :  { %v361_v25 = vsel %vm233_vm10, %v169_v10, %v297_v19  ;;  %424 = vst [vmem:[%s1012_s2 + $0xc8] sm:$0xff] %v360_v24  ;;  %v362_v29 = vsel %vm234_vm11, %v170_v11, %v298_v22  ;;  %v108_v30 = vmul.f32 %v490_v1, %v43_v12  ;;  %v109_v31 = vmul.f32 %v490_v1, %v44_v13  ;;  %v55_v13 = vld [vmem:[%s1010_s0 + $0x150] sm:$0xff]  ;;  %v57_v24 = vld [vmem:[%s1010_s0 + $0x160] sm:$0xff] }
  0x28   :  { %v110_v32 = vmul.f32 %v490_v1, %v45_v16  ;;  %425 = vst [vmem:[%s1012_s2 + $0xd0] sm:$0xff] %v361_v25  ;;  %v363_v33 = vsel %vm235_vm12, %v171_v15, %v299_v26  ;;  %v172_v34 = vadd.f32 %v495_v2, %v107_v27  ;;  %v111_v35 = vmul.f32 %v490_v1, %v46_v20  ;;  %v58_v25 = vld [vmem:[%s1010_s0 + $0x168] sm:$0xff]  ;;  %v59_v26 = vld [vmem:[%s1010_s0 + $0x170] sm:$0xff] }
  0x29   :  { %v112_v36 = vmul.f32 %v490_v1, %v47_v23  ;;  %426 = vst [vmem:[%s1012_s2 + $0xd8] sm:$0xff] %v362_v29  ;;  %v173_v37 = vadd.f32 %v495_v2, %v108_v30  ;;  %v174_v38 = vadd.f32 %v495_v2, %v109_v31  ;;  %v113_v40 = vmul.f32 %v490_v1, %v48_v28 }
  0x2a   :  { %v175_v39 = vadd.f32 %v495_v2, %v110_v32  ;;  %427 = vst [vmem:[%s1012_s2 + $0xe0] sm:$0xff] %v363_v33  ;;  %vm236_vm13 = vcmp.ge.f32.partialorder %v172_v34, 0.0  ;;  %v300_v41 = vmul.f32 0.1, %v172_v34  ;;  %v176_v42 = vadd.f32 %v495_v2, %v111_v35 }
  0x2b   :  { %v177_v43 = vadd.f32 %v495_v2, %v112_v36  ;;  %vm237_vm14 = vcmp.ge.f32.partialorder %v173_v37, 0.0  ;;  %v301_v46 = vmul.f32 0.1, %v173_v37  ;;  %vm238_vm15 = vcmp.ge.f32.partialorder %v174_v38, 0.0 }
  0x2c   :  { %v302_v47 = vmul.f32 0.1, %v174_v38  ;;  %v364_v48 = vsel %vm236_vm13, %v172_v34, %v300_v41  ;;  %vm239_vm0 = vcmp.ge.f32.partialorder %v175_v39, 0.0  ;;  %v303_v49 = vmul.f32 0.1, %v175_v39 }
  0x2d   :  { %vm240_vm1 = vcmp.ge.f32.partialorder %v176_v42, 0.0  ;;  %428 = vst [vmem:[%s1012_s2 + $0xe8] sm:$0xff] %v364_v48  ;;  %v365_v52 = vsel %vm237_vm14, %v173_v37, %v301_v46  ;;  %v304_v54 = vmul.f32 0.1, %v176_v42  ;;  %vm241_vm2 = vcmp.ge.f32.partialorder %v177_v43, 0.0  ;;  %v60_v37 = vld [vmem:[%s1010_s0 + $0x178] sm:$0xff] }
  0x2e   :  { %v366_v53 = vsel %vm238_vm15, %v174_v38, %v302_v47  ;;  %429 = vst [vmem:[%s1012_s2 + $0xf0] sm:$0xff] %v365_v52  ;;  %v367_v55 = vsel %vm239_vm0, %v175_v39, %v303_v49  ;;  %v305_v56 = vmul.f32 0.1, %v177_v43  ;;  %v178_v57 = vadd.f32 %v495_v2, %v113_v40  ;;  %v61_v38 = vld [vmem:[%s1010_s0 + $0x180] sm:$0xff]  ;;  %v62_v39 = vld [vmem:[%s1010_s0 + $0x188] sm:$0xff] }
  0x2f   :  { %v114_v58 = vmul.f32 %v490_v1, %v49_v44  ;;  %430 = vst [vmem:[%s1012_s2 + $0xf8] sm:$0xff] %v366_v53  ;;  %v368_v60 = vsel %vm240_vm1, %v176_v42, %v304_v54  ;;  %v115_v61 = vmul.f32 %v490_v1, %v50_v45  ;;  %v116_v62 = vmul.f32 %v490_v1, %v51_v50  ;;  %v63_v50 = vld [vmem:[%s1010_s0 + $0x190] sm:$0xff] }
  0x30   :  { %v117_v63 = vmul.f32 %v490_v1, %v52_v51  ;;  %431 = vst [vmem:[%s1012_s2 + $0x100] sm:$0xff] %v367_v55  ;;  %v369_v3 = vsel %vm241_vm2, %v177_v43, %v305_v56  ;;  %vm242_vm3 = vcmp.ge.f32.partialorder %v178_v57, 0.0  ;;  %v306_v4 = vmul.f32 0.1, %v178_v57 }
  0x31   :  { %v179_v5 = vadd.f32 %v495_v2, %v114_v58  ;;  %432 = vst [vmem:[%s1012_s2 + $0x108] sm:$0xff] %v368_v60  ;;  %v180_v6 = vadd.f32 %v495_v2, %v115_v61  ;;  %v181_v7 = vadd.f32 %v495_v2, %v116_v62  ;;  %v118_v9 = vmul.f32 %v490_v1, %v53_v59  ;;  %v64_v60 = vld [vmem:[%s1010_s0 + $0x198] sm:$0xff]  ;;  %v65_v61 = vld [vmem:[%s1010_s0 + $0x1a0] sm:$0xff] }
  0x32   :  { %v182_v8 = vadd.f32 %v495_v2, %v117_v63  ;;  %433 = vst [vmem:[%s1012_s2 + $0x110] sm:$0xff] %v369_v3  ;;  %v370_v10 = vsel %vm242_vm3, %v178_v57, %v306_v4  ;;  %v119_v12 = vmul.f32 %v490_v1, %v54_v0  ;;  %v120_v22 = vmul.f32 %v490_v1, %v55_v13  ;;  %v66_v3 = vld [vmem:[%s1010_s0 + $0x1a8] sm:$0xff] }
  0x33   :  { %vm243_vm4 = vcmp.ge.f32.partialorder %v179_v5, 0.0  ;;  %v307_v11 = vmul.f32 0.1, %v179_v5  ;;  %434 = vst [vmem:[%s1012_s2 + $0x118] sm:$0xff] %v370_v10  ;;  %vm244_vm5 = vcmp.ge.f32.partialorder %v180_v6, 0.0  ;;  %vm245_vm6 = vcmp.ge.f32.partialorder %v181_v7, 0.0 }
  0x34   :  { %v308_v15 = vmul.f32 0.1, %v180_v6  ;;  %vm246_vm7 = vcmp.ge.f32.partialorder %v182_v8, 0.0  ;;  %v309_v17 = vmul.f32 0.1, %v181_v7  ;;  %v183_v19 = vadd.f32 %v495_v2, %v118_v9 }
  0x35   :  { %v371_v16 = vsel %vm243_vm4, %v179_v5, %v307_v11  ;;  %v310_v18 = vmul.f32 0.1, %v182_v8  ;;  %v184_v21 = vadd.f32 %v495_v2, %v119_v12  ;;  %v121_v23 = vmul.f32 %v490_v1, %v56_v14  ;;  %v68_v11 = vld [vmem:[%s1010_s0 + $0x1b8] sm:$0xff]  ;;  %v69_v12 = vld [vmem:[%s1010_s0 + $0x1c0] sm:$0xff] }
  0x36   :  { %435 = vst [vmem:[%s1012_s2 + $0x120] sm:$0xff] %v371_v16  ;;  %v372_v20 = vsel %vm244_vm5, %v180_v6, %v308_v15  ;;  %v373_v27 = vsel %vm245_vm6, %v181_v7, %v309_v17  ;;  %vm247_vm8 = vcmp.ge.f32.partialorder %v183_v19, 0.0  ;;  %v311_v29 = vmul.f32 0.1, %v183_v19  ;;  %v67_v6 = vld [vmem:[%s1010_s0 + $0x1b0] sm:$0xff] }
  0x37   :  { %436 = vst [vmem:[%s1012_s2 + $0x128] sm:$0xff] %v372_v20  ;;  %v374_v28 = vsel %vm246_vm7, %v182_v8, %v310_v18  ;;  %vm248_vm9 = vcmp.ge.f32.partialorder %v184_v21, 0.0  ;;  %v312_v30 = vmul.f32 0.1, %v184_v21  ;;  %v185_v31 = vadd.f32 %v495_v2, %v120_v22 }
  0x38   :  { %437 = vst [vmem:[%s1012_s2 + $0x130] sm:$0xff] %v373_v27  ;;  %v186_v32 = vadd.f32 %v495_v2, %v121_v23  ;;  %v375_v33 = vsel %vm247_vm8, %v183_v19, %v311_v29  ;;  %v122_v34 = vmul.f32 %v490_v1, %v57_v24  ;;  %v123_v35 = vmul.f32 %v490_v1, %v58_v25  ;;  %v70_v29 = vld [vmem:[%s1010_s0 + $0x1c8] sm:$0xff] }
  0x39   :  { %438 = vst [vmem:[%s1012_s2 + $0x138] sm:$0xff] %v374_v28  ;;  %v124_v36 = vmul.f32 %v490_v1, %v59_v26  ;;  %v376_v40 = vsel %vm248_vm9, %v184_v21, %v312_v30  ;;  %vm249_vm10 = vcmp.ge.f32.partialorder %v185_v31, 0.0  ;;  %v313_v41 = vmul.f32 0.1, %v185_v31 }
  0x3a   :  { %439 = vst [vmem:[%s1012_s2 + $0x140] sm:$0xff] %v375_v33  ;;  %vm250_vm11 = vcmp.ge.f32.partialorder %v186_v32, 0.0  ;;  %v314_v42 = vmul.f32 0.1, %v186_v32  ;;  %v187_v43 = vadd.f32 %v495_v2, %v122_v34  ;;  %v188_v44 = vadd.f32 %v495_v2, %v123_v35  ;;  %v71_v33 = vld [vmem:[%s1010_s0 + $0x1d0] sm:$0xff]  ;;  %v72_v34 = vld [vmem:[%s1010_s0 + $0x1d8] sm:$0xff] }
  0x3b   :  { %440 = vst [vmem:[%s1012_s2 + $0x148] sm:$0xff] %v376_v40  ;;  %v189_v45 = vadd.f32 %v495_v2, %v124_v36  ;;  %v377_v46 = vsel %vm249_vm10, %v185_v31, %v313_v41  ;;  %v125_v47 = vmul.f32 %v490_v1, %v60_v37  ;;  %v126_v48 = vmul.f32 %v490_v1, %v61_v38  ;;  %v73_v35 = vld [vmem:[%s1010_s0 + $0x1e0] sm:$0xff]  ;;  %v75_v40 = vld [vmem:[%s1010_s0 + $0x1f0] sm:$0xff] }
  0x3c   :  { %v127_v49 = vmul.f32 %v490_v1, %v62_v39  ;;  %441 = vst [vmem:[%s1012_s2 + $0x150] sm:$0xff] %v377_v46  ;;  %v378_v51 = vsel %vm250_vm11, %v186_v32, %v314_v42  ;;  %vm251_vm12 = vcmp.ge.f32.partialorder %v187_v43, 0.0  ;;  %v315_v52 = vmul.f32 0.1, %v187_v43  ;;  %v74_v39 = vld [vmem:[%s1010_s0 + $0x1e8] sm:$0xff] }
  0x3d   :  { %vm252_vm13 = vcmp.ge.f32.partialorder %v188_v44, 0.0  ;;  %442 = vst [vmem:[%s1012_s2 + $0x158] sm:$0xff] %v378_v51  ;;  %v316_v53 = vmul.f32 0.1, %v188_v44  ;;  %vm253_vm14 = vcmp.ge.f32.partialorder %v189_v45, 0.0  ;;  %v190_v55 = vadd.f32 %v495_v2, %v125_v47 }
  0x3e   :  { %v317_v54 = vmul.f32 0.1, %v189_v45  ;;  %v379_v56 = vsel %vm251_vm12, %v187_v43, %v315_v52  ;;  %v191_v57 = vadd.f32 %v495_v2, %v126_v48  ;;  %v192_v58 = vadd.f32 %v495_v2, %v127_v49 }
  0x3f   :  { %v128_v59 = vmul.f32 %v490_v1, %v63_v50  ;;  %443 = vst [vmem:[%s1012_s2 + $0x160] sm:$0xff] %v379_v56  ;;  %v380_v62 = vsel %vm252_vm13, %v188_v44, %v316_v53  ;;  %vm254_vm15 = vcmp.ge.f32.partialorder %v190_v55, 0.0  ;;  %v318_v0 = vmul.f32 0.1, %v190_v55  ;;  %v76_v44 = vld [vmem:[%s1010_s0 + $0x1f8] sm:$0xff] }
  0x40   :  { %v381_v63 = vsel %vm253_vm14, %v189_v45, %v317_v54  ;;  %444 = vst [vmem:[%s1012_s2 + $0x168] sm:$0xff] %v380_v62  ;;  %vm255_vm0 = vcmp.ge.f32.partialorder %v191_v57, 0.0  ;;  %v319_v4 = vmul.f32 0.1, %v191_v57  ;;  %vm256_vm1 = vcmp.ge.f32.partialorder %v192_v58, 0.0 }
  0x41   :  { %v193_v5 = vadd.f32 %v495_v2, %v128_v59  ;;  %445 = vst [vmem:[%s1012_s2 + $0x170] sm:$0xff] %v381_v63  ;;  %v382_v7 = vsel %vm254_vm15, %v190_v55, %v318_v0  ;;  %v320_v8 = vmul.f32 0.1, %v192_v58  ;;  %v129_v9 = vmul.f32 %v490_v1, %v64_v60 }
  0x42   :  { %v130_v10 = vmul.f32 %v490_v1, %v65_v61  ;;  %446 = vst [vmem:[%s1012_s2 + $0x178] sm:$0xff] %v382_v7  ;;  %v383_v13 = vsel %vm255_vm0, %v191_v57, %v319_v4  ;;  %v131_v15 = vmul.f32 %v490_v1, %v66_v3  ;;  %v132_v19 = vmul.f32 %v490_v1, %v67_v6 }
  0x43   :  { %vm257_vm2 = vcmp.ge.f32.partialorder %v193_v5, 0.0  ;;  %v321_v14 = vmul.f32 0.1, %v193_v5  ;;  %447 = vst [vmem:[%s1012_s2 + $0x180] sm:$0xff] %v383_v13  ;;  %v384_v16 = vsel %vm256_vm1, %v192_v58, %v320_v8  ;;  %v194_v17 = vadd.f32 %v495_v2, %v129_v9 }
  0x44   :  { %v195_v18 = vadd.f32 %v495_v2, %v130_v10  ;;  %448 = vst [vmem:[%s1012_s2 + $0x188] sm:$0xff] %v384_v16  ;;  %v196_v21 = vadd.f32 %v495_v2, %v131_v15  ;;  %v133_v22 = vmul.f32 %v490_v1, %v68_v11  ;;  %v134_v23 = vmul.f32 %v490_v1, %v69_v12 }
  0x45   :  { %v385_v20 = vsel %vm257_vm2, %v193_v5, %v321_v14  ;;  %vm258_vm3 = vcmp.ge.f32.partialorder %v194_v17, 0.0  ;;  %v322_v24 = vmul.f32 0.1, %v194_v17  ;;  %v197_v25 = vadd.f32 %v495_v2, %v132_v19 }
  0x46   :  { %449 = vst [vmem:[%s1012_s2 + $0x190] sm:$0xff] %v385_v20  ;;  %vm259_vm4 = vcmp.ge.f32.partialorder %v195_v18, 0.0  ;;  %v323_v26 = vmul.f32 0.1, %v195_v18  ;;  %vm260_vm5 = vcmp.ge.f32.partialorder %v196_v21, 0.0  ;;  %v198_v28 = vadd.f32 %v495_v2, %v133_v22 }
  0x47   :  { %v324_v27 = vmul.f32 0.1, %v196_v21  ;;  %v386_v30 = vsel %vm258_vm3, %v194_v17, %v322_v24  ;;  %vm261_vm6 = vcmp.ge.f32.partialorder %v197_v25, 0.0  ;;  %v325_v31 = vmul.f32 0.1, %v197_v25 }
  0x48   :  { %v199_v32 = vadd.f32 %v495_v2, %v134_v23  ;;  %450 = vst [vmem:[%s1012_s2 + $0x198] sm:$0xff] %v386_v30  ;;  %v387_v36 = vsel %vm259_vm4, %v195_v18, %v323_v26  ;;  %vm262_vm7 = vcmp.ge.f32.partialorder %v198_v28, 0.0  ;;  %v326_v38 = vmul.f32 0.1, %v198_v28 }
  0x49   :  { %v388_v37 = vsel %vm260_vm5, %v196_v21, %v324_v27  ;;  %451 = vst [vmem:[%s1012_s2 + $0x1a0] sm:$0xff] %v387_v36  ;;  %v389_v41 = vsel %vm261_vm6, %v197_v25, %v325_v31  ;;  %v135_v43 = vmul.f32 %v490_v1, %v70_v29  ;;  %v136_v46 = vmul.f32 %v490_v1, %v71_v33 }
  0x4a   :  { %vm263_vm8 = vcmp.ge.f32.partialorder %v199_v32, 0.0  ;;  %v327_v42 = vmul.f32 0.1, %v199_v32  ;;  %452 = vst [vmem:[%s1012_s2 + $0x1a8] sm:$0xff] %v388_v37  ;;  %v390_v45 = vsel %vm262_vm7, %v198_v28, %v326_v38  ;;  %v137_v47 = vmul.f32 %v490_v1, %v72_v34 }
  0x4b   :  { %v138_v48 = vmul.f32 %v490_v1, %v73_v35  ;;  %453 = vst [vmem:[%s1012_s2 + $0x1b0] sm:$0xff] %v389_v41  ;;  %v200_v50 = vadd.f32 %v495_v2, %v135_v43  ;;  %v139_v51 = vmul.f32 %v490_v1, %v74_v39  ;;  %v140_v52 = vmul.f32 %v490_v1, %v75_v40 }
  0x4c   :  { %v391_v49 = vsel %vm263_vm8, %v199_v32, %v327_v42  ;;  %454 = vst [vmem:[%s1012_s2 + $0x1b8] sm:$0xff] %v390_v45  ;;  %v201_v53 = vadd.f32 %v495_v2, %v136_v46  ;;  %v202_v54 = vadd.f32 %v495_v2, %v137_v47  ;;  %v141_v56 = vmul.f32 %v490_v1, %v76_v44 }
  0x4d   :  { %v203_v55 = vadd.f32 %v495_v2, %v138_v48  ;;  %455 = vst [vmem:[%s1012_s2 + $0x1c0] sm:$0xff] %v391_v49  ;;  %vm264_vm9 = vcmp.ge.f32.partialorder %v200_v50, 0.0  ;;  %v328_v57 = vmul.f32 0.1, %v200_v50  ;;  %v204_v58 = vadd.f32 %v495_v2, %v139_v51 }
  0x4e   :  { %v205_v59 = vadd.f32 %v495_v2, %v140_v52  ;;  %vm265_vm10 = vcmp.ge.f32.partialorder %v201_v53, 0.0  ;;  %v329_v60 = vmul.f32 0.1, %v201_v53  ;;  %vm266_vm11 = vcmp.ge.f32.partialorder %v202_v54, 0.0 }
  0x4f   :  { %v330_v61 = vmul.f32 0.1, %v202_v54  ;;  %v392_v62 = vsel %vm264_vm9, %v200_v50, %v328_v57  ;;  %vm267_vm12 = vcmp.ge.f32.partialorder %v203_v55, 0.0  ;;  %v331_v63 = vmul.f32 0.1, %v203_v55 }
  0x50   :  { %vm268_vm13 = vcmp.ge.f32.partialorder %v204_v58, 0.0  ;;  %456 = vst [vmem:[%s1012_s2 + $0x1c8] sm:$0xff] %v392_v62  ;;  %v393_v1 = vsel %vm265_vm10, %v201_v53, %v329_v60  ;;  %v332_v3 = vmul.f32 0.1, %v204_v58  ;;  %vm269_vm14 = vcmp.ge.f32.partialorder %v205_v59, 0.0 }
  0x51   :  { %v394_v0 = vsel %vm266_vm11, %v202_v54, %v330_v61  ;;  %457 = vst [vmem:[%s1012_s2 + $0x1d0] sm:$0xff] %v393_v1  ;;  %v395_v4 = vsel %vm267_vm12, %v203_v55, %v331_v63  ;;  %v333_v5 = vmul.f32 0.1, %v205_v59  ;;  %v206_v6 = vadd.f32 %v495_v2, %v141_v56 }
  0x52   :  { %458 = vst [vmem:[%s1012_s2 + $0x1d8] sm:$0xff] %v394_v0  ;;  %v396_v7 = vsel %vm268_vm13, %v204_v58, %v332_v3 }
  0x53   :  { %459 = vst [vmem:[%s1012_s2 + $0x1e0] sm:$0xff] %v395_v4  ;;  %v397_v8 = vsel %vm269_vm14, %v205_v59, %v333_v5  ;;  %vm270_vm15 = vcmp.ge.f32.partialorder %v206_v6, 0.0  ;;  %v334_v9 = vmul.f32 0.1, %v206_v6 }
  0x54   :  { %460 = vst [vmem:[%s1012_s2 + $0x1e8] sm:$0xff] %v396_v7 }
  0x55   :  { %461 = vst [vmem:[%s1012_s2 + $0x1f0] sm:$0xff] %v397_v8  ;;  %v398_v2 = vsel %vm270_vm15, %v206_v6, %v334_v9 }
  0x56   :  { %462 = vst [vmem:[%s1012_s2 + $0x1f8] sm:$0xff] %v398_v2 }

// kernel: darknet_convolutional.2
= control target key start
LH: loop header
LB: loop body
LE: loop exit
PB: predicated region body
PF: predicated region fallthrough
CT: control target
= control target key end

     0   :  { %s1297_s15 = smov 0   ;;  %s1299_s16 = smov 0   ;;  %s1541_s0 = inlined_call_operand.vmem [shape: bf16[512,128], index: 0, kind: input, shape index: {}]   ;;  %s1542_s1 = inlined_call_operand.vmem [shape: bf16[128,128], index: 1, kind: input, shape index: {}]   ;;  %s1543_s2 = inlined_call_operand.vmem [shape: f32[512,128], index: 2, kind: output, shape index: {0}]   ;;  %s1544_s3 = inlined_call_operand.vmem [shape: f32[16,128], index: 3, kind: output, shape index: {1}]   ;;  %s1545_s4 = inlined_call_operand.vmem [shape: f32[16,128], index: 4, kind: output, shape index: {2}]  }
   0x1   :  { %s1301_s17 = smov 0  }
   0x2 LB: > { %s34_s18 = sadd.s32 1, %s1266_s16  ;;  %p1071_p0 = scmp.ge.s32.totalorder %s1270_s17, 1  ;;  %s1270_s17 = sphi %s1301_s17, %s15_s17   ;;  %s1266_s16 = sphi %s1299_s16, %s1547_s16   ;;  %s1262_s15 = sphi %s1297_s15, %s1546_s15  }
   0x3   : > { %p36_p1 = scmp.ge.s32.totalorder %s34_s18, 2  ;;  %p214_p2 = scmp.lt.s32.totalorder %s1270_s17, 3 }
   0x5   : > { %s1549_s18 = smov (%p36_p1, %s34_s18), 0  ;;  %p215_p3 = pnand %p1071_p0, %p214_p2 }
   0x6   : > { %s1072_s27 = sshll.u32 (!%p215_p3), %s1262_s15, 5  ;;  %p295_p5 = scmp.lt.s32.totalorder (!%p215_p3), %s1262_s15, 1 }
   0x7   : > { %218 = sbr.rel (%p215_p3) target bundleno = 279 (0x117), region = 28  ;;  %p269_p4 = scmp.lt.s32.totalorder (!%p215_p3), %s1072_s27, 63 }
   0xc   : > { %v1199_v0 = vld [vmem:[%s1542_s1 + $0x38] sm:$0xff]  ;;  %v1198_v1 = vld [vmem:[%s1542_s1 + $0x30] sm:$0xff]  ;;  %v1197_v2 = vld [vmem:[%s1542_s1 + $0x28] sm:$0xff]  ;;  %s1551_s27 = smov (!%p269_p4, %s1072_s27), 63  ;;  %s1553_s15 = smov (!%p295_p5, %s1262_s15), 1 }
   0xd   : > { %569 = vmatpush.bf16.msra.mxu0 %v1199_v0  ;;  %1200 = vmatpush.bf16.msra.mxu1 %v1199_v0  ;;  %v1196_v3 = vld [vmem:[%s1542_s1 + $0x20] sm:$0xff]  ;;  %v1195_v4 = vld [vmem:[%s1542_s1 + $0x18] sm:$0xff]  ;;  %v1194_v5 = vld [vmem:[%s1542_s1 + $0x10] sm:$0xff]  ;;  %s1073_s8 = sshll.u32 %s1551_s27, 2  ;;  %s1075_s14 = sshll.u32 %s1551_s27, 3 }
   0xe   : > { %1201 = vmatpush.bf16.msra.mxu2 %v1199_v0  ;;  %1202 = vmatpush.bf16.msra.mxu3 %v1199_v0  ;;  %v1193_v6 = vld [vmem:[%s1542_s1 + $0x8] sm:$0xff]  ;;  %v1192_v7 = vld [vmem:[%s1542_s1] sm:$0xff]  ;;  %s1348_s13 = scalar_lea.vmem %s1541_s0, %s1073_s8  ;;  %s1370_s21 = scalar_lea.vmem %s1543_s2, %s1075_s14 }
   0xf   : > { %v1176_v8 = vld [vmem:[%s1348_s13] sm:$0xff]  ;;  %v1177_v12 = vld [vmem:[%s1348_s13 + $0x8] sm:$0xff]  ;;  %v1178_v16 = vld [vmem:[%s1348_s13 + $0x10] sm:$0xff]  ;;  %s1076_s22 = sshll.u32 %s1553_s15, 3 }
  0x10   : > { %v1180_v9 = vld [vmem:[%s1348_s13 + $0x20] sm:$0xff]  ;;  %v1181_v13 = vld [vmem:[%s1348_s13 + $0x28] sm:$0xff]  ;;  %v1182_v17 = vld [vmem:[%s1348_s13 + $0x30] sm:$0xff]  ;;  %s301_s25 = scalar_lea.vmem %s1544_s3, %s1076_s22  ;;  %s308_s15 = scalar_lea.vmem %s1545_s4, %s1076_s22 }
  0x11   : > { %570 = vmatpush.bf16.msra.mxu0 %v1198_v1  ;;  %1203 = vmatpush.bf16.msra.mxu1 %v1198_v1  ;;  %v1184_v10 = vld [vmem:[%s1348_s13 + $0x40] sm:$0xff]  ;;  %v1185_v14 = vld [vmem:[%s1348_s13 + $0x48] sm:$0xff]  ;;  %v1186_v18 = vld [vmem:[%s1348_s13 + $0x50] sm:$0xff] }
  0x12   : > { %1204 = vmatpush.bf16.msra.mxu2 %v1198_v1  ;;  %1205 = vmatpush.bf16.msra.mxu3 %v1198_v1  ;;  %v1188_v11 = vld [vmem:[%s1348_s13 + $0x60] sm:$0xff]  ;;  %v1189_v15 = vld [vmem:[%s1348_s13 + $0x68] sm:$0xff]  ;;  %v1190_v19 = vld [vmem:[%s1348_s13 + $0x70] sm:$0xff] }
  0x13   : > { %v1179_v20 = vld [vmem:[%s1348_s13 + $0x18] sm:$0xff] }
  0x14   : > { %v1183_v21 = vld [vmem:[%s1348_s13 + $0x38] sm:$0xff] }
  0x15   : > { %571 = vmatpush.bf16.msra.mxu0 %v1197_v2  ;;  %1206 = vmatpush.bf16.msra.mxu1 %v1197_v2  ;;  %v1187_v22 = vld [vmem:[%s1348_s13 + $0x58] sm:$0xff] }
  0x16   : > { %1207 = vmatpush.bf16.msra.mxu2 %v1197_v2  ;;  %1208 = vmatpush.bf16.msra.mxu3 %v1197_v2  ;;  %v1191_v23 = vld [vmem:[%s1348_s13 + $0x78] sm:$0xff] }
  0x19   : > { %572 = vmatpush.bf16.msra.mxu0 %v1196_v3  ;;  %1209 = vmatpush.bf16.msra.mxu1 %v1196_v3 }
  0x1a   : > { %1210 = vmatpush.bf16.msra.mxu2 %v1196_v3  ;;  %1211 = vmatpush.bf16.msra.mxu3 %v1196_v3 }
  0x1d   : > { %573 = vmatpush.bf16.msra.mxu0 %v1195_v4  ;;  %1212 = vmatpush.bf16.msra.mxu1 %v1195_v4 }
  0x1e   : > { %1213 = vmatpush.bf16.msra.mxu2 %v1195_v4  ;;  %1214 = vmatpush.bf16.msra.mxu3 %v1195_v4 }
  0x21   : > { %574 = vmatpush.bf16.msra.mxu0 %v1194_v5  ;;  %1215 = vmatpush.bf16.msra.mxu1 %v1194_v5 }
  0x22   : > { %1216 = vmatpush.bf16.msra.mxu2 %v1194_v5  ;;  %1217 = vmatpush.bf16.msra.mxu3 %v1194_v5 }
  0x25   : > { %575 = vmatpush.bf16.msra.mxu0 %v1193_v6  ;;  %1218 = vmatpush.bf16.msra.mxu1 %v1193_v6 }
  0x26   : > { %1219 = vmatpush.bf16.msra.mxu2 %v1193_v6  ;;  %1220 = vmatpush.bf16.msra.mxu3 %v1193_v6 }
  0x29   : > { %576 = vmatpush.bf16.msra.mxu0 %v1192_v7  ;;  %1221 = vmatpush.bf16.msra.mxu1 %v1192_v7 }
  0x2a   : > { %1222 = vmatpush.bf16.msra.mxu2 %v1192_v7  ;;  %1223 = vmatpush.bf16.msra.mxu3 %v1192_v7 }
  0x2c   : > { %577 = vmatmul.bf16.vlgmr.msra.gmra.mxu0 %v1176_v8  ;;  %597 = vmatmul.bf16.vlgmr.msra.gmra.mxu1 %v1180_v9 }
  0x2d   : > { %617 = vmatmul.bf16.vlgmr.msra.gmra.mxu2 %v1184_v10  ;;  %637 = vmatmul.bf16.vlgmr.msra.gmra.mxu3 %v1188_v11 }
  0x3c   : > { %582 = vmatmul.bf16.gmra.mxu0 %v1177_v12  ;;  %602 = vmatmul.bf16.gmra.mxu1 %v1181_v13 }
  0x3d   : > { %622 = vmatmul.bf16.gmra.mxu2 %v1185_v14  ;;  %642 = vmatmul.bf16.gmra.mxu3 %v1189_v15 }
  0x4c   : > { %587 = vmatmul.bf16.gmra.mxu0 %v1178_v16  ;;  %607 = vmatmul.bf16.gmra.mxu1 %v1182_v17 }
  0x4d   : > { %627 = vmatmul.bf16.gmra.mxu2 %v1186_v18  ;;  %647 = vmatmul.bf16.gmra.mxu3 %v1190_v19 }
  0x5c   : > { %592 = vmatmul.bf16.gmra.mxu0 %v1179_v20  ;;  %612 = vmatmul.bf16.gmra.mxu1 %v1183_v21 }
  0x5d   : > { %632 = vmatmul.bf16.gmra.mxu2 %v1187_v22  ;;  %652 = vmatmul.bf16.gmra.mxu3 %v1191_v23 }
  0xa9   : > { %v578_v24 = vpop.f32.mrf.mxu0  ;;  %v1372_v25 = vpop.f32.mrf.mxu1 }
  0xaa   : > { %757 = vst [vmem:[%s1370_s21] sm:$0xff] %v578_v24  ;;  %v821_v47 = vmul.f32 %v578_v24, %v578_v24  ;;  %v829_v11 = vmul.f32 %v1372_v25, %v1372_v25 }
  0xab   : > { %765 = vst [vmem:[%s1370_s21 + $0x40] sm:$0xff] %v1372_v25 }
  0xb0   : > { %v1377_v26 = vpop.f32.mrf.mxu2  ;;  %v1384_v29 = vpop.f32.mrf.mxu3 }
  0xb1   : > { %v580_v27 = vpop.f32.mrf.mxu0  ;;  %v1379_v28 = vpop.f32.mrf.mxu1  ;;  %773 = vst [vmem:[%s1370_s21 + $0x80] sm:$0xff] %v1377_v26 }
  0xb2   : > { %758 = vst [vmem:[%s1370_s21 + $0x8] sm:$0xff] %v580_v27  ;;  %v822_v46 = vmul.f32 %v580_v27, %v580_v27  ;;  %v789_v48 = vadd.f32 %v580_v27, %v578_v24  ;;  %v830_v14 = vmul.f32 %v1379_v28, %v1379_v28 }
  0xb3   : > { %766 = vst [vmem:[%s1370_s21 + $0x48] sm:$0xff] %v1379_v28 }
  0xb4   : > { %781 = vst [vmem:[%s1370_s21 + $0xc0] sm:$0xff] %v1384_v29  ;;  %v853_v50 = vadd.f32 %v822_v46, %v821_v47 }
  0xb8   : > { %v1390_v30 = vpop.f32.mrf.mxu2  ;;  %v1397_v33 = vpop.f32.mrf.mxu3 }
  0xb9   : > { %v583_v31 = vpop.f32.mrf.mxu0  ;;  %v1392_v32 = vpop.f32.mrf.mxu1  ;;  %774 = vst [vmem:[%s1370_s21 + $0x88] sm:$0xff] %v1390_v30 }
  0xba   : > { %759 = vst [vmem:[%s1370_s21 + $0x10] sm:$0xff] %v583_v31  ;;  %v823_v49 = vmul.f32 %v583_v31, %v583_v31  ;;  %v790_v51 = vadd.f32 %v789_v48, %v583_v31  ;;  %v831_v17 = vmul.f32 %v1392_v32, %v1392_v32 }
  0xbb   : > { %767 = vst [vmem:[%s1370_s21 + $0x50] sm:$0xff] %v1392_v32 }
  0xbc   : > { %782 = vst [vmem:[%s1370_s21 + $0xc8] sm:$0xff] %v1397_v33  ;;  %v854_v56 = vadd.f32 %v853_v50, %v823_v49  ;;  %v837_v49 = vmul.f32 %v1377_v26, %v1377_v26 }
  0xc0   : > { %v1403_v34 = vpop.f32.mrf.mxu2  ;;  %v1410_v37 = vpop.f32.mrf.mxu3 }
  0xc1   : > { %v585_v35 = vpop.f32.mrf.mxu0  ;;  %v1405_v36 = vpop.f32.mrf.mxu1  ;;  %775 = vst [vmem:[%s1370_s21 + $0x90] sm:$0xff] %v1403_v34 }
  0xc2   : > { %760 = vst [vmem:[%s1370_s21 + $0x18] sm:$0xff] %v585_v35  ;;  %v824_v52 = vmul.f32 %v585_v35, %v585_v35  ;;  %v791_v57 = vadd.f32 %v790_v51, %v585_v35  ;;  %v832_v21 = vmul.f32 %v1405_v36, %v1405_v36 }
  0xc3   : > { %768 = vst [vmem:[%s1370_s21 + $0x58] sm:$0xff] %v1405_v36 }
  0xc4   : > { %783 = vst [vmem:[%s1370_s21 + $0xd0] sm:$0xff] %v1410_v37  ;;  %v855_v60 = vadd.f32 %v854_v56, %v824_v52 }
  0xc8   : > { %v1416_v38 = vpop.f32.mrf.mxu2  ;;  %v1423_v41 = vpop.f32.mrf.mxu3 }
  0xc9   : > { %v588_v39 = vpop.f32.mrf.mxu0  ;;  %v1418_v40 = vpop.f32.mrf.mxu1  ;;  %776 = vst [vmem:[%s1370_s21 + $0x98] sm:$0xff] %v1416_v38 }
  0xca   : > { %761 = vst [vmem:[%s1370_s21 + $0x20] sm:$0xff] %v588_v39  ;;  %v825_v58 = vmul.f32 %v588_v39, %v588_v39  ;;  %v792_v61 = vadd.f32 %v791_v57, %v588_v39  ;;  %v840_v57 = vmul.f32 %v1416_v38, %v1416_v38 }
  0xcb   : > { %769 = vst [vmem:[%s1370_s21 + $0x60] sm:$0xff] %v1418_v40 }
  0xcc   : > { %784 = vst [vmem:[%s1370_s21 + $0xd8] sm:$0xff] %v1423_v41  ;;  %v856_v63 = vadd.f32 %v855_v60, %v825_v58 }
  0xd0   : > { %v1429_v42 = vpop.f32.mrf.mxu2  ;;  %v1436_v45 = vpop.f32.mrf.mxu3 }
  0xd1   : > { %v590_v43 = vpop.f32.mrf.mxu0  ;;  %v1431_v44 = vpop.f32.mrf.mxu1  ;;  %777 = vst [vmem:[%s1370_s21 + $0xa0] sm:$0xff] %v1429_v42 }
  0xd2   : > { %762 = vst [vmem:[%s1370_s21 + $0x28] sm:$0xff] %v590_v43  ;;  %v826_v62 = vmul.f32 %v590_v43, %v590_v43  ;;  %v793_v0 = vadd.f32 %v792_v61, %v590_v43  ;;  %v834_v31 = vmul.f32 %v1431_v44, %v1431_v44 }
  0xd3   : > { %770 = vst [vmem:[%s1370_s21 + $0x68] sm:$0xff] %v1431_v44 }
  0xd4   : > { %785 = vst [vmem:[%s1370_s21 + $0xe0] sm:$0xff] %v1436_v45  ;;  %v857_v2 = vadd.f32 %v856_v63, %v826_v62 }
  0xd8   : > { %v1442_v53 = vpop.f32.mrf.mxu2  ;;  %v1447_v59 = vpop.f32.mrf.mxu3 }
  0xd9   : > { %v593_v54 = vpop.f32.mrf.mxu0  ;;  %v613_v55 = vpop.f32.mrf.mxu1  ;;  %778 = vst [vmem:[%s1370_s21 + $0xa8] sm:$0xff] %v1442_v53  ;;  %v842_v63 = vmul.f32 %v1442_v53, %v1442_v53 }
  0xda   : > { %763 = vst [vmem:[%s1370_s21 + $0x30] sm:$0xff] %v593_v54  ;;  %v827_v1 = vmul.f32 %v593_v54, %v593_v54  ;;  %v794_v3 = vadd.f32 %v793_v0, %v593_v54  ;;  %v835_v43 = vmul.f32 %v613_v55, %v613_v55 }
  0xdb   : > { %771 = vst [vmem:[%s1370_s21 + $0x70] sm:$0xff] %v613_v55 }
  0xdc   : > { %786 = vst [vmem:[%s1370_s21 + $0xe8] sm:$0xff] %v1447_v59  ;;  %v858_v7 = vadd.f32 %v857_v2, %v827_v1 }
  0xe0   : > { %v633_v4 = vpop.f32.mrf.mxu2  ;;  %v1454_v10 = vpop.f32.mrf.mxu3 }
  0xe1   : > { %v595_v5 = vpop.f32.mrf.mxu0  ;;  %v615_v6 = vpop.f32.mrf.mxu1  ;;  %779 = vst [vmem:[%s1370_s21 + $0xb0] sm:$0xff] %v633_v4  ;;  %v843_v2 = vmul.f32 %v633_v4, %v633_v4 }
  0xe2   : > { %764 = vst [vmem:[%s1370_s21 + $0x38] sm:$0xff] %v595_v5  ;;  %v795_v8 = vadd.f32 %v794_v3, %v595_v5  ;;  %v828_v9 = vmul.f32 %v595_v5, %v595_v5  ;;  %v836_v48 = vmul.f32 %v615_v6, %v615_v6 }
  0xe3   : > { %772 = vst [vmem:[%s1370_s21 + $0x78] sm:$0xff] %v615_v6 }
  0xe4   : > { %v796_v12 = vadd.f32 %v795_v8, %v1372_v25  ;;  %v859_v13 = vadd.f32 %v858_v7, %v828_v9  ;;  %787 = vst [vmem:[%s1370_s21 + $0xf0] sm:$0xff] %v1454_v10  ;;  %v833_v25 = vmul.f32 %v1418_v40, %v1418_v40  ;;  %v846_v8 = vmul.f32 %v1397_v33, %v1397_v33 }
  0xe6   : > { %v797_v15 = vadd.f32 %v796_v12, %v1379_v28  ;;  %v860_v16 = vadd.f32 %v859_v13, %v829_v11  ;;  %v848_v13 = vmul.f32 %v1423_v41, %v1423_v41 }
  0xe8   : > { %v798_v18 = vadd.f32 %v797_v15, %v1392_v32  ;;  %v861_v19 = vadd.f32 %v860_v16, %v830_v14  ;;  %v635_v20 = vpop.f32.mrf.mxu2  ;;  %v1472_v24 = vpop.f32.mrf.mxu3  ;;  %v849_v15 = vmul.f32 %v1436_v45, %v1436_v45 }
  0xe9   : > { %780 = vst [vmem:[%s1370_s21 + $0xb8] sm:$0xff] %v635_v20 }
  0xea   : > { %v862_v22 = vadd.f32 %v861_v19, %v831_v17  ;;  %v799_v23 = vadd.f32 %v798_v18, %v1405_v36  ;;  %788 = vst [vmem:[%s1370_s21 + $0xf8] sm:$0xff] %v1472_v24  ;;  %v850_v18 = vmul.f32 %v1447_v59, %v1447_v59 }
  0xec   : > { %v800_v27 = vadd.f32 %v799_v23, %v1418_v40  ;;  %v863_v28 = vadd.f32 %v862_v22, %v832_v21  ;;  %v838_v40 = vmul.f32 %v1390_v30, %v1390_v30  ;;  %v852_v22 = vmul.f32 %v1472_v24, %v1472_v24 }
  0xee   : > { %v801_v32 = vadd.f32 %v800_v27, %v1431_v44  ;;  %v864_v35 = vadd.f32 %v863_v28, %v833_v25  ;;  %v839_v44 = vmul.f32 %v1403_v34, %v1403_v34 }
  0xf0   : > { %v802_v39 = vadd.f32 %v801_v32, %v613_v55  ;;  %v865_v46 = vadd.f32 %v864_v35, %v834_v31 }
  0xf2   : > { %v866_v36 = vadd.f32 %v865_v46, %v835_v43  ;;  %v803_v47 = vadd.f32 %v802_v39, %v615_v6  ;;  %v845_v6 = vmul.f32 %v1384_v29, %v1384_v29 }
  0xf4   : > { %v804_v50 = vadd.f32 %v803_v47, %v1377_v26  ;;  %v867_v51 = vadd.f32 %v866_v36, %v836_v48  ;;  %v841_v26 = vmul.f32 %v1429_v42, %v1429_v42 }
  0xf6   : > { %v805_v52 = vadd.f32 %v804_v50, %v1390_v30  ;;  %v868_v54 = vadd.f32 %v867_v51, %v837_v49 }
  0xf8   : > { %v806_v55 = vadd.f32 %v805_v52, %v1403_v34  ;;  %v869_v56 = vadd.f32 %v868_v54, %v838_v40 }
  0xfa   : > { %v870_v58 = vadd.f32 %v869_v56, %v839_v44  ;;  %v807_v60 = vadd.f32 %v806_v55, %v1416_v38  ;;  %v844_v38 = vmul.f32 %v635_v20, %v635_v20 }
  0xfc   : > { %v808_v61 = vadd.f32 %v807_v60, %v1429_v42  ;;  %v871_v62 = vadd.f32 %v870_v58, %v840_v57 }
  0xfe   : > { %v809_v30 = vadd.f32 %v808_v61, %v1442_v53  ;;  %v872_v34 = vadd.f32 %v871_v62, %v841_v26 }
 0x100   : > { %v873_v0 = vadd.f32 %v872_v34, %v842_v63  ;;  %v810_v1 = vadd.f32 %v809_v30, %v633_v4  ;;  %v847_v4 = vmul.f32 %v1410_v37, %v1410_v37 }
 0x102   : > { %v874_v3 = vadd.f32 %v873_v0, %v843_v2  ;;  %v811_v5 = vadd.f32 %v810_v1, %v635_v20 }
 0x104   : > { %v812_v42 = vadd.f32 %v811_v5, %v1384_v29  ;;  %v875_v7 = vadd.f32 %v874_v3, %v844_v38 }
 0x106   : > { %v813_v9 = vadd.f32 %v812_v42, %v1397_v33  ;;  %v876_v53 = vadd.f32 %v875_v7, %v845_v6 }
 0x108   : > { %v814_v11 = vadd.f32 %v813_v9, %v1410_v37  ;;  %v877_v12 = vadd.f32 %v876_v53, %v846_v8 }
 0x10a   : > { %v878_v14 = vadd.f32 %v877_v12, %v847_v4  ;;  %v815_v29 = vadd.f32 %v814_v11, %v1423_v41  ;;  %v851_v41 = vmul.f32 %v1454_v10, %v1454_v10 }
 0x10c   : > { %v816_v33 = vadd.f32 %v815_v29, %v1436_v45  ;;  %v879_v16 = vadd.f32 %v878_v14, %v848_v13 }
 0x10e   : > { %v817_v17 = vadd.f32 %v816_v33, %v1447_v59  ;;  %v880_v37 = vadd.f32 %v879_v16, %v849_v15 }
 0x110   : > { %v881_v19 = vadd.f32 %v880_v37, %v850_v18  ;;  %v818_v20 = vadd.f32 %v817_v17, %v1454_v10 }
 0x112   : > { %v882_v21 = vadd.f32 %v881_v19, %v851_v41  ;;  %v819_v45 = vadd.f32 %v818_v20, %v1472_v24 }
 0x114   : > { %820 = vst [vmem:[%s301_s25] sm:$0xff] %v819_v45  ;;  %v883_v59 = vadd.f32 %v882_v21, %v852_v22 }
 0x116   : > { %884 = vst [vmem:[%s308_s15] sm:$0xff] %v883_v59 }
 0x117 PF: > { %s15_s17 = sadd.s32 1, %s1270_s17   ;;  %s1546_s15 = smov %s1266_s16 }
 0x118   : > { %p12_p6 = scmp.ge.s32.totalorder %s15_s17, 4   ;;  %s1547_s16 = smov %s1549_s18 }
 0x11a   :  { %14 = sbr.rel (!%p12_p6) target bundleno = 2 (0x2), region = 93 }

</bundles_post_ra>
